<compile_context>
chip_gen: v7x
topology: tpu7x:2x2x1
jax: 0.10.0
libtpu: 0.0.40
codegen_flags: <defaults>
</compile_context>

<pallas_src>
import functools

import jax
import jax.numpy as jnp
from jax.experimental import pallas as pl
from jax.experimental.pallas import tpu as pltpu


_FUSED_KRON_MAX_BYTES = 2 * 1024 * 1024   # max size of the f32 Kronecker matrix
_MAX_P_TILE = 8192                        # pixel-lane tile for the separable path


# ----------------------------- Pallas kernels --------------------------------

def _fused_kernel(xs_ref, wbT_ref, bb_ref, whT_ref, upT_ref, o_ref):
    """Backbone + ReLU + hypernet 1x1 conv + Kronecker bilinear upsample (fused).

    xs  : (1, K, P)     bf16  space-to-depth pixels (K = 4*C_in, P = Hp*Wp)
    wbT : (C_feat, K)   bf16  backbone 2x2/stride-2 conv weight (transposed)
    bb  : (C_feat, 1)   f32   backbone bias
    whT : (D, C_feat)   f32   hypernet-generated 1x1 conv weight
    upT : (P, H*W)      f32   kron(Uph, Upw)^T  (align_corners=True bilinear)
    o   : (1, D, H*W)   f32   final descriptor image, pixels-in-lanes
    """
    feat = jnp.dot(wbT_ref[...], xs_ref[0], preferred_element_type=jnp.float32)
    feat = jnp.maximum(feat + bb_ref[...], 0.0)                       # (C_feat, P)
    y = jnp.dot(whT_ref[...], feat, preferred_element_type=jnp.float32)   # (D, P)
    o_ref[0] = jnp.dot(y, upT_ref[...], preferred_element_type=jnp.float32)


def _feature_kernel(xs_ref, wbT_ref, bb_ref, whT_ref, y_ref):
    """Backbone conv (as matmul) + ReLU + hypernet 1x1 conv, one (image, pixel-tile).

    xs  : (1, K, Pt)    bf16
    wbT : (C_feat, K)   bf16
    bb  : (C_feat, 1)   f32
    whT : (D, C_feat)   f32
    y   : (1, D, Pt)    bf16  descriptor map at backbone resolution (half traffic)
    """
    feat = jnp.dot(wbT_ref[...], xs_ref[0], preferred_element_type=jnp.float32)
    feat = jnp.maximum(feat + bb_ref[...], 0.0)
    y = jnp.dot(whT_ref[...], feat, preferred_element_type=jnp.float32)
    y_ref[0] = y.astype(jnp.bfloat16)


def _upsample_kernel(g_blk, y_ref, uph_ref, upwT_ref, o_ref):
    """Separable bilinear upsample, G_BLK (image, channel) slices per grid step.

    y    : (G, Hp, Wp)  bf16
    uph  : (H, Hp)      bf16  row interpolation matrix (align_corners=True)
    upwT : (Wp, W)      bf16  column interpolation matrix, transposed
    o    : (G, H, W)    f32
    """
    for g in range(g_blk):   # small static unroll; amortizes per-step overhead
        yw = jnp.dot(y_ref[g], upwT_ref[...],
                     preferred_element_type=jnp.float32)              # (Hp, W)
        o_ref[g] = jnp.dot(uph_ref[...], yw.astype(jnp.bfloat16),
                           preferred_element_type=jnp.float32)        # (H, W)


# ------------------------------- glue helpers --------------------------------

def _bilinear_matrix(out_size, in_size):
    """Interpolation matrix matching F.upsample_bilinear (align_corners=True)."""
    if in_size == 1:
        return jnp.ones((out_size, 1), jnp.float32)
    idx = jnp.arange(out_size, dtype=jnp.float32)
    src = idx * (in_size - 1) / max(out_size - 1, 1)
    i0 = jnp.clip(jnp.floor(src).astype(jnp.int32), 0, in_size - 2)
    frac = src - i0.astype(jnp.float32)
    rows = jnp.arange(out_size)
    m = jnp.zeros((out_size, in_size), jnp.float32)
    m = m.at[rows, i0].add(1.0 - frac)
    m = m.at[rows, i0 + 1].add(frac)
    return m


def _space_to_depth_cfirst(x_nchw):
    """(N, C, H, W) -> (N, 4*C, (H/2)*(W/2)); K ordering is (dy, dx, c)."""
    n, c, h, w = x_nchw.shape
    hp, wp = h // 2, w // 2
    x5 = x_nchw.reshape(n, c, hp, 2, wp, 2)            # (n, c, ph, dy, pw, dx)
    x5 = x5.transpose(0, 3, 5, 1, 2, 4)                # (n, dy, dx, c, ph, pw)
    return x5.reshape(n, 4 * c, hp * wp)


def _pick_p_tile(p, max_tile=_MAX_P_TILE):
    """Largest multiple-of-128 divisor of p <= max_tile (or p itself if small)."""
    if p <= max_tile:
        return p
    for t in range(max_tile - max_tile % 128, 127, -128):
        if p % t == 0:
            return t
    return p   # fallback: full pixel row (block == full dim is always legal)


def _pick_g_blk(g_total, h, w, out_budget_bytes=2 * 1024 * 1024):
    """Largest divisor of g_total whose f32 output block fits the budget (<=8)."""
    cap = max(1, min(8, out_budget_bytes // (h * w * 4)))
    for g in range(min(cap, g_total), 0, -1):
        if g_total % g == 0:
            return g
    return 1


# ------------------------------ forward wrapper -------------------------------

def opsinglenet_forward(x_nchw, params):
    n, c_in, h, w = x_nchw.shape
    assert h % 2 == 0 and w % 2 == 0, "synthetic 2x2/stride-2 backbone needs even H, W"
    hp, wp = h // 2, w // 2
    c_feat = params["w_backbone"].shape[0]
    d = params["descriptor_dimension"]
    k = 4 * c_in
    p = hp * wp
    hw = h * w

    # ---- hypernet(z): tiny GEMV, plain jnp (no kernel launch) ----
    flat_w = params["z"] @ params["w_hypernet"] + params["b_hypernet"]
    whT = flat_w.reshape(d, c_feat).astype(jnp.float32)        # conv2d (out, in) layout

    # ---- space-to-depth straight from NCHW into channels-first (K, P) layout ----
    xsT = _space_to_depth_cfirst(x_nchw).astype(jnp.bfloat16)  # (N, K, P)
    wbT = params["w_backbone"].astype(jnp.bfloat16)            # (C_feat, K)
    bb = params["b_backbone"].reshape(c_feat, 1).astype(jnp.float32)

    uph = _bilinear_matrix(h, hp)                              # (H, Hp)  f32
    upw = _bilinear_matrix(w, wp)                              # (W, Wp)  f32

    # ======================= path 1: fully fused (small images) ====================
    # One pallas_call; output written as (1, D, H*W) lane-dense slabs.
    if p * hw * 4 <= _FUSED_KRON_MAX_BYTES:
        upT = jnp.kron(uph, upw).T                             # (P, H*W) f32, tiny
        out = pl.pallas_call(
            _fused_kernel,
            out_shape=jax.ShapeDtypeStruct((n, d, hw), jnp.float32),
            grid_spec=pltpu.PrefetchScalarGridSpec(
                num_scalar_prefetch=0,
                grid=(n,),
                in_specs=[
                    pl.BlockSpec((1, k, p), lambda b: (b, 0, 0)),
                    pl.BlockSpec((c_feat, k), lambda b: (0, 0)),
                    pl.BlockSpec((c_feat, 1), lambda b: (0, 0)),
                    pl.BlockSpec((d, c_feat), lambda b: (0, 0)),
                    pl.BlockSpec((p, hw), lambda b: (0, 0)),
                ],
                out_specs=pl.BlockSpec((1, d, hw), lambda b: (b, 0, 0)),
            ),
            compiler_params=pltpu.CompilerParams(
                dimension_semantics=("parallel",)),
        )(xsT, wbT, bb, whT, upT)
        return out.reshape(n, d, h, w)                         # free reshape to NCHW

    # ================= path 2: separable two-kernel (large images) =================
    # (Typically W >= 128 here, so the (G, H, W) output blocks are lane-dense.)
    p_tile = _pick_p_tile(p)
    n_pt = p // p_tile

    # ---- kernel 1: backbone + ReLU + 1x1 conv; grid over (batch, pixel tiles) ----
    y = pl.pallas_call(
        _feature_kernel,
        out_shape=jax.ShapeDtypeStruct((n, d, p), jnp.bfloat16),   # bf16 intermediate
        grid_spec=pltpu.PrefetchScalarGridSpec(
            num_scalar_prefetch=0,
            grid=(n, n_pt),
            in_specs=[
                pl.BlockSpec((1, k, p_tile), lambda b, t: (b, 0, t)),
                pl.BlockSpec((c_feat, k), lambda b, t: (0, 0)),
                pl.BlockSpec((c_feat, 1), lambda b, t: (0, 0)),
                pl.BlockSpec((d, c_feat), lambda b, t: (0, 0)),
            ],
            out_specs=pl.BlockSpec((1, d, p_tile), lambda b, t: (b, 0, t)),
        ),
        compiler_params=pltpu.CompilerParams(
            dimension_semantics=("parallel", "parallel")),
    )(xsT, wbT, bb, whT)

    # ---- kernel 2: separable bilinear upsample, G_BLK channels per grid step ----
    g_total = n * d
    g_blk = _pick_g_blk(g_total, h, w)
    y3 = y.reshape(g_total, hp, wp)                             # free, row-major
    uph_b = uph.astype(jnp.bfloat16)
    upwT_b = upw.T.astype(jnp.bfloat16)

    out = pl.pallas_call(
        functools.partial(_upsample_kernel, g_blk),
        out_shape=jax.ShapeDtypeStruct((g_total, h, w), jnp.float32),
        grid_spec=pltpu.PrefetchScalarGridSpec(
            num_scalar_prefetch=0,
            grid=(g_total // g_blk,),
            in_specs=[
                pl.BlockSpec((g_blk, hp, wp), lambda g: (g, 0, 0)),
                pl.BlockSpec((h, hp), lambda g: (0, 0)),
                pl.BlockSpec((wp, w), lambda g: (0, 0)),
            ],
            out_specs=pl.BlockSpec((g_blk, h, w), lambda g: (g, 0, 0)),
        ),
        compiler_params=pltpu.CompilerParams(
            dimension_semantics=("parallel",)),
    )(y3, uph_b, upwT_b)

    return out.reshape(n, d, h, w)                              # already NCHW


# ------------------------------ pure-JAX reference ----------------------------

def _reference_forward(x_nchw, params):
    n, c_in, h, w = x_nchw.shape
    hp, wp = h // 2, w // 2
    d = params["descriptor_dimension"]

    flat_w = params["z"] @ params["w_hypernet"] + params["b_hypernet"]
    c_feat = params["w_backbone"].shape[0]
    whT = flat_w.reshape(d, c_feat)

    xsT = _space_to_depth_cfirst(x_nchw)                           # (N, 4C, P)
    feat = jnp.einsum("fk,nkp->nfp", params["w_backbone"], xsT)
    feat = jnp.maximum(feat + params["b_backbone"][None, :, None], 0.0)
    y = jnp.einsum("df,nfp->ndp", whT, feat).reshape(n, d, hp, wp)

    uph = _bilinear_matrix(h, hp)
    upw = _bilinear_matrix(w, wp)
    out = jnp.einsum("ih,ndhw->ndiw", uph, y)                      # H upsample
    out = jnp.einsum("jw,ndiw->ndij", upw, out)                    # W upsample
    return out


# ----------------------------------- main --------------------------------------

def _run_case(case_idx, n, c_in, h, w, z_dim, c_feat, d):
    key = jax.random.fold_in(jax.random.PRNGKey(0), case_idx)
    k_z, k_hw, k_hb, k_bw, k_bb, k_x = jax.random.split(key, 6)
    params = {
        "z": jax.random.normal(k_z, (z_dim,), jnp.float32),   # nn.Parameter(torch.randn(z_dim))
        "w_hypernet": 0.1 * jax.random.normal(k_hw, (z_dim, d * c_feat), jnp.float32),
        "b_hypernet": 0.1 * jax.random.normal(k_hb, (d * c_feat,), jnp.float32),
        "w_backbone": 0.1 * jax.random.normal(k_bw, (c_feat, 4 * c_in), jnp.float32),
        "b_backbone": 0.1 * jax.random.normal(k_bb, (c_feat,), jnp.float32),
        "descriptor_dimension": d,
    }
    x = jax.random.normal(k_x, (n, c_in, h, w), jnp.float32)

    out = jax.block_until_ready(opsinglenet_forward(x, params))
    ref = jax.block_until_ready(_reference_forward(x, params))

    assert out.shape == (n, d, h, w), out.shape
    err = float(jnp.max(jnp.abs(out - ref)))
    assert err < 5e-2, f"case {case_idx}: mismatch vs reference: {err}"


if __name__ == "__main__":
    # Primary (spec) shape: exercises the fully fused single-kernel path.
    _run_case(0, n=2, c_in=4, h=16, w=16, z_dim=16, c_feat=8, d=3)
    # Larger shape: exercises the separable two-kernel (tiled, bf16-intermediate) path.
    _run_case(1, n=1, c_in=2, h=128, w=128, z_dim=16, c_feat=8, d=3)
    print("KERNEL_OK")
</pallas_src>

<mosaic_0001>
module attributes {stable_mosaic.version = 11 : i64} {
  func.func @_fused_kernel(%arg0: i32, %arg1: memref<1x16x64xbf16, #tpu.memory_space<vmem>>, %arg2: memref<8x16xbf16, #tpu.memory_space<vmem>>, %arg3: memref<8x1xf32, #tpu.memory_space<vmem>>, %arg4: memref<3x8xf32, #tpu.memory_space<vmem>>, %arg5: memref<64x256xf32, #tpu.memory_space<vmem>>, %arg6: memref<1x3x256xf32, #tpu.memory_space<vmem>>) attributes {dimension_semantics = [#tpu.dimension_semantics<parallel>], iteration_bounds = array<i64: 2>, scalar_prefetch = 0 : i64, scratch_operands = 0 : i64, tpu.core_type = #tpu.core_type<tc>, window_params = [{transform_indices = @transform_0, window_bounds = array<i64: 1, 16, 64>}, {pipeline_mode = #tpu.pipeline_mode<synchronous>, transform_indices = @transform_1, window_bounds = array<i64: 8, 16>}, {pipeline_mode = #tpu.pipeline_mode<synchronous>, transform_indices = @transform_2, window_bounds = array<i64: 8, 1>}, {pipeline_mode = #tpu.pipeline_mode<synchronous>, transform_indices = @transform_3, window_bounds = array<i64: 3, 8>}, {pipeline_mode = #tpu.pipeline_mode<synchronous>, transform_indices = @transform_4, window_bounds = array<i64: 64, 256>}, {transform_indices = @transform_5, window_bounds = array<i64: 1, 3, 256>}]} {
    %c0 = arith.constant 0 : index
    %c0_0 = arith.constant 0 : index
    %0 = vector.load %arg2[%c0, %c0_0] : memref<8x16xbf16, #tpu.memory_space<vmem>>, vector<8x16xbf16>
    %c0_1 = arith.constant 0 : index
    %c0_2 = arith.constant 0 : index
    %c0_3 = arith.constant 0 : index
    %1 = vector.load %arg1[%c0_1, %c0_2, %c0_3] : memref<1x16x64xbf16, #tpu.memory_space<vmem>>, vector<1x16x64xbf16>
    %2 = vector.shape_cast %1 : vector<1x16x64xbf16> to vector<16x64xbf16>
    %cst = arith.constant dense<0.000000e+00> : vector<8x64xf32>
    %3 = tpu.matmul %0, %2, %cst {dimension_numbers = #tpu.dot_dimension_numbers<[1], [0], [0], [1], [0, 0, 1, 1], [], []>} : vector<8x16xbf16>, vector<16x64xbf16>, vector<8x64xf32> -> vector<8x64xf32>
    %c0_4 = arith.constant 0 : index
    %c0_5 = arith.constant 0 : index
    %4 = vector.load %arg3[%c0_4, %c0_5] : memref<8x1xf32, #tpu.memory_space<vmem>>, vector<8x1xf32>
    %5 = vector.broadcast %4 : vector<8x1xf32> to vector<8x64xf32>
    %6 = arith.addf %3, %5 : vector<8x64xf32>
    %cst_6 = arith.constant 0.000000e+00 : f32
    %7 = vector.broadcast %cst_6 : f32 to vector<8x64xf32>
    %8 = arith.maximumf %6, %7 : vector<8x64xf32>
    %c0_7 = arith.constant 0 : index
    %c0_8 = arith.constant 0 : index
    %9 = vector.load %arg4[%c0_7, %c0_8] : memref<3x8xf32, #tpu.memory_space<vmem>>, vector<3x8xf32>
    %cst_9 = arith.constant dense<0.000000e+00> : vector<3x64xf32>
    %10 = tpu.matmul %9, %8, %cst_9 {dimension_numbers = #tpu.dot_dimension_numbers<[1], [0], [0], [1], [0, 0, 1, 1], [], []>} : vector<3x8xf32>, vector<8x64xf32>, vector<3x64xf32> -> vector<3x64xf32>
    %c0_10 = arith.constant 0 : index
    %c0_11 = arith.constant 0 : index
    %11 = vector.load %arg5[%c0_10, %c0_11] : memref<64x256xf32, #tpu.memory_space<vmem>>, vector<64x256xf32>
    %cst_12 = arith.constant dense<0.000000e+00> : vector<3x256xf32>
    %12 = tpu.matmul %10, %11, %cst_12 {dimension_numbers = #tpu.dot_dimension_numbers<[1], [0], [0], [1], [0, 0, 1, 1], [], []>} : vector<3x64xf32>, vector<64x256xf32>, vector<3x256xf32> -> vector<3x256xf32>
    %c0_13 = arith.constant 0 : index
    %c0_14 = arith.constant 0 : index
    %c0_15 = arith.constant 0 : index
    %13 = vector.load %arg6[%c0_13, %c0_14, %c0_15] : memref<1x3x256xf32, #tpu.memory_space<vmem>>, vector<1x3x256xf32>
    %14 = vector.shape_cast %13 : vector<1x3x256xf32> to vector<3x256xf32>
    %15 = vector.shape_cast %12 : vector<3x256xf32> to vector<1x3x256xf32>
    tpu.vector_store %arg6[%c0_13, %c0_14, %c0_15], %15 {strides = array<i32>} : memref<1x3x256xf32, #tpu.memory_space<vmem>>, vector<1x3x256xf32>,
    return
  }
  func.func @transform_0(%arg0: i32) -> (i32, i32, i32) {
    %c0_i32 = arith.constant 0 : i32
    %c0_i32_0 = arith.constant 0 : i32
    %c0_i32_1 = arith.constant 0 : i32
    return %arg0, %c0_i32, %c0_i32_0 : i32, i32, i32
  }
  func.func @transform_1(%arg0: i32) -> (i32, i32) {
    %c0_i32 = arith.constant 0 : i32
    %c0_i32_0 = arith.constant 0 : i32
    %c0_i32_1 = arith.constant 0 : i32
    return %c0_i32, %c0_i32_0 : i32, i32
  }
  func.func @transform_2(%arg0: i32) -> (i32, i32) {
    %c0_i32 = arith.constant 0 : i32
    %c0_i32_0 = arith.constant 0 : i32
    %c0_i32_1 = arith.constant 0 : i32
    return %c0_i32, %c0_i32_0 : i32, i32
  }
  func.func @transform_3(%arg0: i32) -> (i32, i32) {
    %c0_i32 = arith.constant 0 : i32
    %c0_i32_0 = arith.constant 0 : i32
    %c0_i32_1 = arith.constant 0 : i32
    return %c0_i32, %c0_i32_0 : i32, i32
  }
  func.func @transform_4(%arg0: i32) -> (i32, i32) {
    %c0_i32 = arith.constant 0 : i32
    %c0_i32_0 = arith.constant 0 : i32
    %c0_i32_1 = arith.constant 0 : i32
    return %c0_i32, %c0_i32_0 : i32, i32
  }
  func.func @transform_5(%arg0: i32) -> (i32, i32, i32) {
    %c0_i32 = arith.constant 0 : i32
    %c0_i32_0 = arith.constant 0 : i32
    %c0_i32_1 = arith.constant 0 : i32
    return %arg0, %c0_i32, %c0_i32_0 : i32, i32, i32
  }
}

</mosaic_0001>

<bundles_post_ra>
// kernel: tpu_custom_call.1
= control target key start
LH: loop header
LB: loop body
LE: loop exit
PB: predicated region body
PF: predicated region fallthrough
CT: control target
= control target key end

     0   :  { %10 = vsyncpa [#allocation3], 0  ;;  %s967_s0 = inlined_call_operand.hbm [shape: bf16[2,16,64], index: 0, kind: input, shape index: {}]   ;;  %s968_s1 = inlined_call_operand.vmem [shape: bf16[8,16], index: 1, kind: input, shape index: {}]   ;;  %s969_s2 = inlined_call_operand.vmem [shape: f32[8,1], index: 2, kind: input, shape index: {}]   ;;  %s970_s3 = inlined_call_operand.vmem [shape: f32[3,8], index: 3, kind: input, shape index: {}]   ;;  %s971_s4 = inlined_call_operand.hbm [shape: f32[64,256], index: 4, kind: input, shape index: {}]   ;;  %s972_s5 = inlined_call_operand.vmem [shape: f32[2,3,256], index: 5, kind: output, shape index: {}]  }
   0x1   :  { %12 = vsyncpa [#allocation3 + $0x1], 0 }
   0x2   :  { %13 = vsyncpa [#allocation5], 0  ;;  %s816_s18 = smov 0   ;;  %s818_s19 = smov 0  }
   0x3   :  { %s820_s20 = smov 0   ;;  %s822_s21 = smov 0  }
   0x4 LB: > { %s835_s22 = sadd.s32 4294967295, %s775_s21   ;;  %p39_p0 = scmp.ne.s32.totalorder %s767_s19, %s763_s18  ;;  %s775_s21 = sphi %s822_s21, %s988_s21   ;;  %s771_s20 = sphi %s820_s20, %s987_s20   ;;  %s767_s19 = sphi %s818_s19, %s986_s19   ;;  %s763_s18 = sphi %s816_s18, %s985_s18  }
   0x5   : > { %p973_p1 = scmp.eq.s32.totalorder %s835_s22, 0  ;;  %p570_p2 = scmp.ge.s32.totalorder %s775_s21, 1 }
   0x6   : > { %p160_p3 = scmp.lt.s32.totalorder %s775_s21, 3  ;;  %s777_s25 = smov [#allocation4]  }
   0x7   : > { %p843_p4 = por %p973_p1, %p39_p0  ;;  %s181_s26 = sshll.u32 %s777_s25, 4  ;;  %s182_s26 = int_to_ptr.vmem [resolvable:$true] %s181_s26 }
   0x8   : > { %p847_p5 = pnand %p570_p2, %p160_p3  ;;  %s860_s28 = sadd.s32 1, %s775_s21  }
   0x9   : > { %s976_s23 = scalar_select %p843_p4, 1, 0 }
   0xa   : > { %s977_s24 = scalar_select %p847_p5, 1, 0 }
   0xb   : > { %p626_p6 = pneg %p847_p5  ;;  %s26_s29 = sadd.s32 1, %s771_s20 }
   0xc   : > { %s23_s30 = ssub.s32 %s775_s21, %s860_s28  ;;  %s679_s8 = scalar_lea.hbm %s971_s4, 2048 }
   0xd   : > { %p855_p7 = pnand %p626_p6, %p973_p1  ;;  %p680_p8 = scmp.ne.s32.totalorder %s971_s4, %s679_s8 }
   0xe   : > { %p686_p12 = scmp.lt.u32.totalorder %s679_s8, %s971_s4 }
   0xf   : > { %p681_p9 = pneg %p855_p7 }
  0x11   : > { %p682_p10 = pnand %p681_p9, %p680_p8 }
  0x13   : > { %p683_p11 = pneg %p682_p10 }
  0x15   : > { %p688_p13 = pnand %p686_p12, %p683_p11 }
  0x17   : > { %691 = shalt.err (!%p688_p13)
}
  0x18   : > { %s692_s13 = scalar_lea.vmem %s182_s26, 2048  ;;  %p700_p6 = scmp.lt.s32.totalorder %s182_s26, %s182_s26 }
  0x19   : > { %p693_p0 = scmp.ne.s32.totalorder %s182_s26, %s692_s13  ;;  %p701_p1 = scmp.lt.s32.totalorder %s692_s13, %s692_s13 }
  0x1b   : > { %p695_p2 = pnand %p693_p0, %p681_p9  ;;  %p702_p4 = por %p701_p1, %p700_p6 }
  0x1d   : > { %p696_p3 = pneg %p695_p2 }
  0x1f   : > { %p703_p5 = pnand %p702_p4, %p696_p3 }
  0x21   : > { %706 = shalt.err (!%p703_p5)
}
  0x22   : > { %s778_s14 = smov 256   ;;  %s779_s15 = smov 16  }
  0x23   : > { %629 = dma.hbm_to_vmem [thread:$0]  (!%p855_p7), %s971_s4, 2048, %s182_s26, [#allocation5], %s778_s14, %s778_s14, %s779_s15  }
  0x24   : > { %p24_p8 = scmp.eq.s32.totalorder %s23_s30, 0  ;;  %p33_p9 = scmp.ne.s32.totalorder %s771_s20, %s767_s19 }
  0x25   : > { %p34_p1 = scmp.eq.s32.totalorder %s775_s21, 0  ;;  %p635_p4 = scmp.lt.s32.totalorder %s775_s21, 2 }
  0x26   : > { %s886_s18 = scalar_select %p24_p8, %s771_s20, %s26_s29  }
  0x27   : > { %p35_p5 = por %p34_p1, %p33_p9  ;;  %s195_s25 = sand.u32 1, %s771_s20  }
  0x28   : > { %s573_s6 = sshll.u32 %s195_s25, 3  ;;  %s587_s7 = sshll.u32 %s775_s21, 7 }
  0x29   : > { %s893_s10 = scalar_lea.hbm %s967_s0, %s587_s7  ;;  %s199_s26 = scalar_lea.vmem [#allocation2], %s573_s6 }
  0x2a   : > { %s206_s27 = sshll.u32 %s199_s26, 4  ;;  %p897_p7 = pnand %p635_p4, %p35_p5  ;;  %s895_s27 = int_to_ptr.vmem [resolvable:$true] %s206_s27 }
  0x2b   : > { %s901_s21 = scalar_lea.sflag [#allocation3], %s195_s25  ;;  %s707_s30 = scalar_lea.hbm %s893_s10, 128 }
  0x2c   : > { %p708_p10 = scmp.ne.s32.totalorder %s893_s10, %s707_s30  ;;  %p709_p11 = pneg %p897_p7 }
  0x2d   : > { %s712_s13 = scalar_lea.hbm %s967_s0, 256  ;;  %p713_p0 = scmp.lt.u32.totalorder %s893_s10, %s967_s0 }
  0x2e   : > { %p710_p12 = pnand %p709_p11, %p708_p10  ;;  %p714_p2 = scmp.lt.u32.totalorder %s712_s13, %s707_s30 }
  0x2f   : > { %p716_p6 = scmp.lt.u32.totalorder %s707_s30, %s893_s10 }
  0x30   : > { %p711_p13 = pneg %p710_p12  ;;  %p715_p3 = por %p714_p2, %p713_p0 }
  0x32   : > { %p717_p8 = por %p716_p6, %p715_p3 }
  0x34   : > { %p718_p9 = pnand %p717_p8, %p711_p13 }
  0x36   : > { %721 = shalt.err (!%p718_p9)
}
  0x37   : > { %s722_s16 = scalar_lea.vmem %s895_s27, 128  ;;  %s780_s17 = smov [#allocation2]  }
  0x38   : > { %p723_p1 = scmp.ne.s32.totalorder %s895_s27, %s722_s16  ;;  %s727_s25 = sshll.u32 %s780_s17, 4  ;;  %s728_s25 = int_to_ptr.vmem [resolvable:$false] %s727_s25 }
  0x39   : > { %s729_s6 = scalar_lea.vmem %s728_s25, 256  ;;  %p730_p10 = scmp.lt.s32.totalorder %s895_s27, %s728_s25 }
  0x3a   : > { %p725_p4 = pnand %p723_p1, %p709_p11  ;;  %p731_p12 = scmp.lt.s32.totalorder %s729_s6, %s722_s16 }
  0x3c   : > { %p726_p5 = pneg %p725_p4  ;;  %p732_p0 = por %p731_p12, %p730_p10 }
  0x3e   : > { %p733_p2 = pnand %p732_p0, %p726_p5 }
  0x40   : > { %736 = shalt.err (!%p733_p2)
}
  0x41   : > { %s781_s7 = smov 64   ;;  %s782_s8 = smov 4  }
  0x42   : > { %633 = dma.hbm_to_vmem [thread:$0]  (!%p897_p7), %s893_s10, 128, %s895_s27, %s901_s21, %s781_s7, %s781_s7, %s782_s8  }
  0x43   : > { %p980_p11 = scmp.ne.s32.totalorder %s977_s24, 0 }
  0x44   : > { %s220_s9 = sand.u32 (!%p980_p11), 1, %s767_s19   ;;  %p981_p13 = scmp.ne.s32.totalorder (!%p980_p11), %s976_s23, 0 }
  0x45   : > { %218 = sbr.rel (%p980_p11) target bundleno = 731 (0x2db), region = 40  ;;  %s577_s26 = sshll.u32 (!%p980_p11), %s220_s9, 3 }
  0x46   : > { %s221_s30 = scalar_lea.sflag (!%p980_p11), [#allocation3], %s220_s9  ;;  %s224_s11 = scalar_lea.vmem (!%p980_p11), [#allocation2], %s577_s26 }
  0x4c   : > { %754 = dma.done.wait (%p981_p13), %s221_s30, 128  }
  0x4d   : > { %756 = vsyncadd (%p981_p13), %s221_s30, 4294967168  ;;  %p982_p3 = scmp.eq.s32.totalorder %s835_s22, 0 }
  0x4f   : > { %758 = dma.done.wait (%p982_p3), [#allocation5], 2048   ;;  %p983_p6 = pmov %p982_p3 }
  0x50   : > { %v783_v0 = vmov 0.0   ;;  %vm784_vm0 = vmmov 0   ;;  %v785_v1 = vmov 0   ;;  %v678_v2 = vld [vmem:[%s224_s11] sm:$0xff]   ;;  %vm276_vm1 = vcmask 130048   ;;  %v397_v5 = vld [vmem:[#allocation4 + $0x8] sm:$0xff] }
  0x51   : > { %760 = vsyncadd (%p983_p6), [#allocation5], 4294965248  ;;  %593 = vmatprep.subr.bf16.mxu0 %v783_v0  ;;  %595 = vmatprep.mubr.msk.bf16.mxu0 %vm784_vm0, %v783_v0  ;;  %v264_v3 = vld [vmem:[%s969_s2] sm:$0xff]  ;;  %v399_v6 = vld [vmem:[#allocation4 + $0x18] sm:$0xff]  ;;  %vm322_vm2 = vcmask 64512   ;;  %vm412_vm3 = vcmask 523264  }
  0x52   : > { %677 = vset.pattern.permute.xlu0 %v785_v1  ;;  %480 = vmatprep.mubr.f32.mxu1 %v783_v0  ;;  %v261_v4 = vld [vmem:[%s968_s1] sm:$0xf]  ;;  %v396_v7 = vld [vmem:[#allocation4] sm:$0xff]  ;;  %v604_v8 = vpack.c.bf16 %v399_v6, %v397_v5  ;;  %v401_v10 = vld [vmem:[#allocation4 + $0x28] sm:$0xff]  ;;  %p255_p7 = scmp.lt.s32.totalorder %s835_s22, 1 }
  0x53   : > { %594 = vmatpush3.bf16.msra.mxu0 %v678_v2  ;;  %267 = vperm.xlu0 %677, %v264_v3   ;;  %v398_v9 = vld [vmem:[#allocation4 + $0x10] sm:$0xff]  ;;  %v403_v11 = vld [vmem:[#allocation4 + $0x38] sm:$0xff]  ;;  %v400_v14 = vld [vmem:[#allocation4 + $0x20] sm:$0xff] }
  0x54   : > { %599 = vmatprep.subr.mxu0 %v783_v0  ;;  %v606_v12 = vpack.c.bf16 %v398_v9, %v396_v7  ;;  %v608_v13 = vpack.c.bf16 %v403_v11, %v401_v10  ;;  %v402_v15 = vld [vmem:[#allocation4 + $0x30] sm:$0xff]  ;;  %v405_v16 = vld [vmem:[#allocation4 + $0x48] sm:$0xff]  ;;  %605 = vmatprep.subr.bf16.mxu1 %v604_v8  ;;  %v407_v17 = vld [vmem:[#allocation4 + $0x58] sm:$0xff]  ;;  %s990_s22 = smov (!%p255_p7, %s835_s22), 1 }
  0x55   : > { %v610_v18 = vpack.c.bf16 %v402_v15, %v400_v14  ;;  %v612_v19 = vpack.c.bf16 %v407_v17, %v405_v16  ;;  %v404_v20 = vld [vmem:[#allocation4 + $0x40] sm:$0xff]  ;;  %v406_v21 = vld [vmem:[#allocation4 + $0x50] sm:$0xff]  ;;  %v409_v22 = vld [vmem:[#allocation4 + $0x68] sm:$0xff]  ;;  %s588_s12 = sshll.u32 %s990_s22, 3 }
  0x56   : > { %596 = vmatmul.mubr.msk.bf16.vlgmr.msra.gmra.mrb[0].mxu0 %vm276_vm1, %v261_v4  ;;  %607 = vmatpush1.bf16.msra.mxu1 %v606_v12  ;;  %v411_v23 = vld [vmem:[#allocation4 + $0x78] sm:$0xff]  ;;  %v614_v24 = vpack.c.bf16 %v406_v21, %v404_v20  ;;  %v408_v26 = vld [vmem:[#allocation4 + $0x60] sm:$0xff]  ;;  %v410_v27 = vld [vmem:[#allocation4 + $0x70] sm:$0xff]  ;;  %s259_s15 = scalar_lea.vmem %s972_s5, %s588_s12 }
  0x57   : > { %601 = vmatprep.mubr.msk.f32.mxu0 %vm784_vm0, %v783_v0  ;;  %609 = vmatprep.subr.bf16.mxu1 %v608_v13  ;;  %v616_v25 = vpack.c.bf16 %v411_v23, %v409_v22  ;;  %v618_v28 = vpack.c.bf16 %v410_v27, %v408_v26  ;;  %v321_v36 = vld [vmem:[%s970_s3] sm:$0x7] }
  0x5a   : > { %611 = vmatpush1.bf16.msra.mxu1 %v610_v18 }
  0x5b   : > { %613 = vmatprep.subr.bf16.mxu1 %v612_v19 }
  0x5e   : > { %615 = vmatpush1.bf16.msra.mxu1 %v614_v24 }
  0x5f   : > { %617 = vmatprep.subr.bf16.mxu1 %v616_v25 }
  0x62   : > { %619 = vmatpush1.bf16.msra.mxu1 %v618_v28 }
  0xd2   : > { %v268_v29 = vpop.permute.xlu0 %267 }
 0x129   : > { %v314_v30 = vpop.f32.mrb[0].mxu0 }
 0x12a   : > { %v315_v31 = vadd.f32 %v314_v30, %v268_v29  ;;  %v597_v32 = vpop.f32.mrb[1].mxu0 }
 0x12b   : > { %v317_v33 = vpop.f32.mrb[2].mxu0 }
 0x12c   : > { %v320_v34 = vmax.f32 %v315_v31, 0.0  ;;  %v598_v35 = vpop.f32.mrb[3].mxu0 }
 0x12e   : > { %600 = vmatpush3.msra.mxu0 %v320_v34 }
 0x12f   : > { %602 = vmatmul.mubr.msk.f32.vlgmr.msra.gmra.mrb[4].mxu0 %vm322_vm2, %v321_v36 }
 0x202   : > { %v392_v37 = vpop.f32.mrb[4].mxu0 }
 0x203   : > { %v603_v38 = vpop.f32.mrb[5].mxu0  ;;  %584 = vmatmul.mubr.msk.f32.vlgmr.msra.gmra.mrb[0].mxu1 %vm412_vm3, %v392_v37 }
 0x2d6   : > { %v482_v39 = vpop.f32.mrb[0].mxu1 }
 0x2d7   : > { %v484_v40 = vpop.f32.mrb[1].mxu1 }
 0x2d8   : > { %v489_v41 = vcombine.low %v482_v39, %v484_v40 }
 0x2da   : > { %491 = vst [vmem:[%s259_s15] sm:$0x77] %v489_v41 }
 0x2db PF: > { %s984_s16 = smov %s886_s18  ;;  %p16_p8 = scmp.ge.s32.totalorder %s860_s28, 4  }
 0x2dc   : > { %s985_s18 = smov %s767_s19  ;;  %s986_s19 = smov %s771_s20 }
 0x2dd   : > { %s987_s20 = smov %s984_s16  ;;  %s988_s21 = smov %s860_s28 }
 0x2de   :  { %18 = sbr.rel (!%p16_p8) target bundleno = 4 (0x4), region = 84 }
 0x2e5   :  { %513 = vsyncpa [#allocation3], 1 }
 0x2e6   :  { %515 = vsyncpa [#allocation3 + $0x1], 1 }
 0x2e7   :  { %516 = vsyncpa [#allocation5], 1 }

</bundles_post_ra>
